<compile_context>
chip_gen: v5e
topology: v5e:2x2
jax: 0.10.0
libtpu: 0.0.40
codegen_flags: <defaults>
</compile_context>

<pallas_src>
import math

import jax
import jax.numpy as jnp
from jax.experimental import pallas as pl
from jax.experimental.pallas import tpu as pltpu


def _build_pos_embedding(embedding_size: int, maximum_position_length: int,
                         dtype=jnp.float32) -> jnp.ndarray:
    """Deterministic positional table, identical to the PyTorch __initialize."""
    den = jnp.exp(-jnp.arange(0, embedding_size, 2, dtype=jnp.float32)
                  * (math.log(10000.0) / embedding_size))
    pos = jnp.arange(0, maximum_position_length, dtype=jnp.float32).reshape(
        maximum_position_length, 1)
    angles = pos * den                                   # (max_len, E//2)
    pe = jnp.zeros((maximum_position_length, embedding_size), jnp.float32)
    pe = pe.at[:, 0::2].set(jnp.sin(angles))
    pe = pe.at[:, 1::2].set(jnp.cos(angles))
    pe = pe[:, None, :]                                  # (max_len, 1, E) module layout
    return pe.astype(dtype)


def _pos_encoding_kernel(tok_ref, pos_ref, out_ref):
    # tok_ref / out_ref: (TS, B, E) VMEM tiles; pos_ref: (TS, E) dense VMEM tile.
    pos = pos_ref[...]                                   # (TS, E)
    out_ref[...] = (tok_ref[...] + pos[:, None, :]).astype(out_ref.dtype)


def positional_encoding_forward(token_embedding: jnp.ndarray,
                                pos_embedding: jnp.ndarray,
                                *,
                                target_tile_bytes: int = 2 << 20) -> jnp.ndarray:
    """token_embedding: (S, B, E); pos_embedding: (max_len, 1, E); returns (S, B, E)."""
    s, b, e = token_embedding.shape
    max_len = pos_embedding.shape[0]
    assert s <= max_len, "sequence length exceeds maximum_position_length"

    dtype = token_embedding.dtype
    itemsize = int(jnp.dtype(dtype).itemsize)

    # 2-D lane/sublane-dense positional slab in the token dtype; `[:s]` is the
    # module's pos_embedding[:token_embedding.size(0)] slice.
    pos2d = pos_embedding.reshape(max_len, e).astype(dtype)[:s]      # (S, E)

    # Tile size over the sequence axis, chosen from a VMEM byte budget so that
    # double-buffered (in + out + pos) tiles fit even v5e's 16 MiB scoped default.
    row_bytes = b * e * itemsize
    ts = max(1, min(s, target_tile_bytes // max(row_bytes, 1)))
    if ts < s:
        # When tiling, the pos block's second-to-last dim must be a multiple of 8.
        ts = max(8, (ts // 8) * 8)
    num_tiles = pl.cdiv(s, ts)

    tok_tile_bytes = ts * b * e * itemsize
    pos_tile_bytes = ts * e * itemsize
    working_set = 2 * (2 * tok_tile_bytes + pos_tile_bytes)          # double buffered
    vmem_limit = int(min(max(working_set + (4 << 20), 16 << 20), 64 << 20))

    cost = pl.CostEstimate(
        flops=s * b * e,
        transcendentals=0,
        bytes_accessed=2 * s * b * e * itemsize + s * e * itemsize,
    )

    return pl.pallas_call(
        _pos_encoding_kernel,
        out_shape=jax.ShapeDtypeStruct((s, b, e), dtype),
        grid=(num_tiles,),
        in_specs=[
            # Token tile: (TS, B, E); last two dims equal full array dims -> legal.
            pl.BlockSpec((ts, b, e), lambda i: (i, 0, 0)),
            # Dense 2-D positional tile: (TS, E).
            pl.BlockSpec((ts, e), lambda i: (i, 0)),
        ],
        out_specs=pl.BlockSpec((ts, b, e), lambda i: (i, 0, 0)),
        compiler_params=pltpu.CompilerParams(
            dimension_semantics=("parallel",),
            vmem_limit_bytes=vmem_limit,
        ),
        cost_estimate=cost,
    )(token_embedding, pos2d)


if __name__ == "__main__":
    embedding_size = 32
    maximum_position_length = 16
    seq_len = 8
    batch = 2

    key = jax.random.PRNGKey(0)
    token_embedding = jax.random.normal(
        key, (seq_len, batch, embedding_size), dtype=jnp.float32)

    pos_embedding = _build_pos_embedding(embedding_size, maximum_position_length)

    out = positional_encoding_forward(token_embedding, pos_embedding)
    out = jax.block_until_ready(out)

    # Sanity check against the plain-JAX reference of the PyTorch forward.
    ref = token_embedding + pos_embedding[:seq_len, :]
    assert out.shape == (seq_len, batch, embedding_size)
    assert jnp.allclose(out, ref, atol=1e-6), "mismatch vs reference"

    print("KERNEL_OK")
</pallas_src>

<mosaic_0001>
module attributes {stable_mosaic.version = 11 : i64} {
  func.func @_pos_encoding_kernel(%arg0: i32, %arg1: memref<8x2x32xf32, #tpu.memory_space<vmem>>, %arg2: memref<8x32xf32, #tpu.memory_space<vmem>>, %arg3: memref<8x2x32xf32, #tpu.memory_space<vmem>>) attributes {dimension_semantics = [#tpu.dimension_semantics<parallel>], iteration_bounds = array<i64: 1>, scalar_prefetch = 0 : i64, scratch_operands = 0 : i64, tpu.core_type = #tpu.core_type<tc>, window_params = [{transform_indices = @transform_0, window_bounds = array<i64: 8, 2, 32>}, {transform_indices = @transform_1, window_bounds = array<i64: 8, 32>}, {transform_indices = @transform_2, window_bounds = array<i64: 8, 2, 32>}]} {
    %c0 = arith.constant 0 : index
    %c0_0 = arith.constant 0 : index
    %0 = vector.load %arg2[%c0, %c0_0] : memref<8x32xf32, #tpu.memory_space<vmem>>, vector<8x32xf32>
    %c0_1 = arith.constant 0 : index
    %c0_2 = arith.constant 0 : index
    %c0_3 = arith.constant 0 : index
    %1 = vector.load %arg1[%c0_1, %c0_2, %c0_3] : memref<8x2x32xf32, #tpu.memory_space<vmem>>, vector<8x2x32xf32>
    %2 = vector.shape_cast %0 : vector<8x32xf32> to vector<8x1x32xf32>
    %3 = vector.broadcast %2 : vector<8x1x32xf32> to vector<8x2x32xf32>
    %4 = arith.addf %1, %3 : vector<8x2x32xf32>
    %c0_4 = arith.constant 0 : index
    %c0_5 = arith.constant 0 : index
    %c0_6 = arith.constant 0 : index
    %5 = vector.load %arg3[%c0_4, %c0_5, %c0_6] : memref<8x2x32xf32, #tpu.memory_space<vmem>>, vector<8x2x32xf32>
    tpu.vector_store %arg3[%c0_4, %c0_5, %c0_6], %4 {strides = array<i32>} : memref<8x2x32xf32, #tpu.memory_space<vmem>>, vector<8x2x32xf32>,
    return
  }
  func.func @transform_0(%arg0: i32) -> (i32, i32, i32) {
    %c0_i32 = arith.constant 0 : i32
    %c0_i32_0 = arith.constant 0 : i32
    %c0_i32_1 = arith.constant 0 : i32
    return %arg0, %c0_i32, %c0_i32_0 : i32, i32, i32
  }
  func.func @transform_1(%arg0: i32) -> (i32, i32) {
    %c0_i32 = arith.constant 0 : i32
    %c0_i32_0 = arith.constant 0 : i32
    return %arg0, %c0_i32 : i32, i32
  }
  func.func @transform_2(%arg0: i32) -> (i32, i32, i32) {
    %c0_i32 = arith.constant 0 : i32
    %c0_i32_0 = arith.constant 0 : i32
    %c0_i32_1 = arith.constant 0 : i32
    return %arg0, %c0_i32, %c0_i32_0 : i32, i32, i32
  }
}

</mosaic_0001>

<bundles_post_ra>
// kernel: tpu_custom_call.1
= control target key start
LH: loop header
LB: loop body
LE: loop exit
PB: predicated region body
PF: predicated region fallthrough
CT: control target
= control target key end

     0   :  { %7 = vsyncpa [#allocation3], 0  ;;  %s238_s0 = inlined_call_operand.hbm [shape: f32[8,2,32], index: 0, kind: input, shape index: {}]   ;;  %s239_s1 = inlined_call_operand.hbm [shape: f32[8,32], index: 1, kind: input, shape index: {}]   ;;  %s240_s2 = inlined_call_operand.hbm [shape: f32[8,2,32], index: 2, kind: output, shape index: {}]  }
   0x1   :  { %8 = vsyncpa [#allocation6], 0 }
   0x2   :  { %9 = vsyncpa [#allocation4], 0  ;;  %s14_s11 = sshll.u32 %s238_s0, 4  ;;  %s195_s12 = smov [#allocation2]   ;;  %s15_s11 = int_to_ptr.hbm [resolvable:$true] %s14_s11 }
   0x3   :  { %s16_s13 = sshll.u32 %s195_s12, 4  ;;  %s28_s16 = sshll.u32 %s239_s1, 4  ;;  %s17_s13 = int_to_ptr.vmem [resolvable:$true] %s16_s13  ;;  %s29_s16 = int_to_ptr.hbm [resolvable:$true] %s28_s16 }
   0x4   :  { %s196_s17 = smov 32   ;;  %s197_s18 = smov 2  }
   0x5   :  { %22 = dma.hbm_to_vmem [thread:$0]  %s15_s11, 256, %s17_s13, [#allocation3], %s196_s17, %s196_s17, %s197_s18  }
   0x6   :  { %s198_s19 = smov [#allocation5]  }
   0x7   :  { %s30_s20 = sshll.u32 %s198_s19, 4  ;;  %s31_s20 = int_to_ptr.vmem [resolvable:$true] %s30_s20 }
   0x8   :  { %33 = dma.hbm_to_vmem [thread:$0]  %s29_s16, 128, %s31_s20, [#allocation6]  }
   0x9   :  { %189 = dma.done.wait [#allocation3], 256  }
   0xa   :  { %190 = vsyncadd [#allocation3], 4294967040 }
   0xb   :  { %191 = dma.done.wait [#allocation6], 128  }
   0xc   :  { %192 = vsyncadd [#allocation6], 4294967168  ;;  %v42_v0 = vld [vmem:[#allocation5] sm:$0xff]  ;;  %v43_v1 = vld [vmem:[#allocation2] sm:$0x3]  ;;  %vm83_vm0 = vcmask 254976  }
   0xd   :  { %v59_v2 = vperm.slane %v42_v0, 0  ;;  %v44_v3 = vld [vmem:[#allocation2 + $0x2] sm:$0x3]  ;;  %v52_v4 = vrot.slane %v42_v0, 1  ;;  %v53_v5 = vrot.slane %v42_v0, 2  ;;  %v54_v6 = vrot.slane %v42_v0, 3 }
   0xe   :  { %v45_v7 = vld [vmem:[#allocation2 + $0x4] sm:$0x3]  ;;  %v46_v8 = vld [vmem:[#allocation2 + $0x6] sm:$0x3]  ;;  %v55_v9 = vrot.slane %v42_v0, 4  ;;  %v56_v10 = vrot.slane %v42_v0, 5 }
   0xf   :  { %v75_v11 = vadd.f32 %v59_v2, %v43_v1  ;;  %v60_v12 = vperm.slane %v52_v4, 0  ;;  %v61_v13 = vperm.slane %v53_v5, 0  ;;  %v62_v14 = vperm.slane %v54_v6, 0  ;;  %v47_v15 = vld [vmem:[#allocation2 + $0x8] sm:$0x3]  ;;  %s199_s0 = smov [#allocation7]  }
  0x10   :  { %v63_v16 = vperm.slane %v55_v9, 0  ;;  %v48_v17 = vld [vmem:[#allocation2 + $0xa] sm:$0x3]  ;;  %v64_v18 = vperm.slane %v56_v10, 0  ;;  %v57_v19 = vrot.slane %v42_v0, 6  ;;  %v58_v20 = vrot.slane %v42_v0, 7 }
  0x11   :  { %84 = vst.msk [vmem:[#allocation7] sm:$0x3] %vm83_vm0, %v75_v11  ;;  %v76_v21 = vadd.f32 %v60_v12, %v44_v3  ;;  %v77_v22 = vadd.f32 %v61_v13, %v45_v7  ;;  %v78_v23 = vadd.f32 %v62_v14, %v46_v8  ;;  %v49_v24 = vld [vmem:[#allocation2 + $0xc] sm:$0x3]  ;;  %v50_v27 = vld [vmem:[#allocation2 + $0xe] sm:$0x3] }
  0x12   :  { %v79_v25 = vadd.f32 %v63_v16, %v47_v15  ;;  %v65_v26 = vperm.slane %v57_v19, 0  ;;  %v66_v28 = vperm.slane %v58_v20, 0  ;;  %v80_v29 = vadd.f32 %v64_v18, %v48_v17  ;;  %s96_s1 = sshll.u32 %s199_s0, 4  ;;  %s98_s23 = sshll.u32 %s240_s2, 4  ;;  %s97_s1 = int_to_ptr.vmem [resolvable:$true] %s96_s1  ;;  %s99_s23 = int_to_ptr.hbm [resolvable:$true] %s98_s23 }
  0x13   :  { %85 = vst.msk [vmem:[#allocation7 + $0x2] sm:$0x3] %vm83_vm0, %v76_v21 }
  0x14   :  { %86 = vst.msk [vmem:[#allocation7 + $0x4] sm:$0x3] %vm83_vm0, %v77_v22  ;;  %v81_v30 = vadd.f32 %v65_v26, %v49_v24  ;;  %v82_v31 = vadd.f32 %v66_v28, %v50_v27 }
  0x15   :  { %87 = vst.msk [vmem:[#allocation7 + $0x6] sm:$0x3] %vm83_vm0, %v78_v23 }
  0x16   :  { %88 = vst.msk [vmem:[#allocation7 + $0x8] sm:$0x3] %vm83_vm0, %v79_v25 }
  0x17   :  { %89 = vst.msk [vmem:[#allocation7 + $0xa] sm:$0x3] %vm83_vm0, %v80_v29 }
  0x18   :  { %90 = vst.msk [vmem:[#allocation7 + $0xc] sm:$0x3] %vm83_vm0, %v81_v30 }
  0x19   :  { %91 = vst.msk [vmem:[#allocation7 + $0xe] sm:$0x3] %vm83_vm0, %v82_v31 }
  0x1a   :  { %104 = dma.vmem_to_hbm [thread:$0]  %s97_s1, 256, %s99_s23, [#allocation4], %s196_s17, %s196_s17, %s197_s18  }
  0x1b   :  { %193 = dma.done.wait [#allocation4], 256  }
  0x1c   :  { %194 = vsyncadd [#allocation4], 4294967040 }
  0x1d   :  { %109 = vsyncpa [#allocation3], 1 }
  0x1e   :  { %110 = vsyncpa [#allocation6], 1 }
  0x1f   :  { %111 = vsyncpa [#allocation4], 1 }

</bundles_post_ra>
